<compile_context>
chip_gen: v7x
topology: tpu7x:2x2x1
jax: 0.10.0
libtpu: 0.0.40
codegen_flags: <defaults>
</compile_context>

<pallas_src>
import numpy as np
import jax
import jax.numpy as jnp
from jax.experimental import pallas as pl
from jax.experimental.pallas import tpu as pltpu

ANCHORS = [[10, 13], [16, 30], [33, 23], [30, 61], [62, 45],
           [59, 119], [116, 90], [156, 198], [373, 326]]


# ----------------------------------------------------------------------------
# Pallas kernel: sum of squares of one (S, S) objectness-channel slice
# ----------------------------------------------------------------------------
def _objsq_kernel(x_ref, out_ref):
    # x_ref:   (S, S) slice of batch_x[b, c*(5+C)]  (leading dims squeezed)
    # out_ref: (8, 128) lane-dense partial block; the scalar sum is splat
    #          across the block (the wrapper reads element [0, 0]).
    x = x_ref[...].astype(jnp.float32)             # (S, S)
    sq = x * x                                     # VPU: one mul per vreg
    row = jnp.sum(sq, axis=1, keepdims=True)       # (S, 1) lane reduce (XLU)
    ssq = jnp.sum(row, axis=0, keepdims=True)      # (1, 1) sublane reduce
    out_ref[...] = jnp.broadcast_to(ssq, out_ref.shape)


def objectness_sumsq(batch_x, *, C):
    """Per-image sum of squares over the 3 objectness channels of
    batch_x (B, 3*(5+C), S, S).  Returns (B,) f32 sums."""
    B, Nc, S, S2 = batch_x.shape
    assert S == S2 and Nc == 3 * (5 + C)

    partial = pl.pallas_call(
        _objsq_kernel,
        grid=(B, 3),
        # Read objectness channel c*(5+C) straight out of batch_x; block is
        # the full (S, S) spatial extent so no padding / masking is needed.
        in_specs=[pl.BlockSpec((None, None, S, S),
                               lambda b, c: (b, c * (5 + C), 0, 0))],
        # One lane-dense (8,128) partial per (b, c); written exactly once,
        # so both grid axes can be 'parallel' (no accumulator dependency).
        out_specs=pl.BlockSpec((None, None, 8, 128),
                               lambda b, c: (b, c, 0, 0)),
        out_shape=jax.ShapeDtypeStruct((B, 3, 8, 128), jnp.float32),
        compiler_params=pltpu.CompilerParams(
            dimension_semantics=("parallel", "parallel")),
    )(batch_x)

    return jnp.sum(partial[:, :, 0, 0], axis=1)    # (B,)


# ----------------------------------------------------------------------------
# Host-side helpers (mirror the .item()-driven PyTorch control flow exactly)
# ----------------------------------------------------------------------------
def _iou(b1, b2):
    A = (b1[2] - b1[0] + 1) * (b1[3] - b1[1] + 1)
    B = (b2[2] - b2[0] + 1) * (b2[3] - b2[1] + 1)
    CM = (min(b1[2], b2[2]) - max(b1[0], b2[0]) + 1) * \
         (min(b1[3], b2[3]) - max(b1[1], b2[1]) + 1)
    return CM / (A + B - CM)


def _iou_index(w, h):
    mx, ind = 0, 0
    for i, a in enumerate(ANCHORS):
        v = _iou([0, 0, a[0], a[1]], [0, 0, w, h])
        if mx < v:
            mx, ind = v, i
    return ind


def _sigmoid(z):
    return 1.0 / (1.0 + np.exp(-z))


# ----------------------------------------------------------------------------
# Forward pass (== Yolo.forward)
# ----------------------------------------------------------------------------
def yolo_forward(batch_x, batch_box, *, s_index, e_index, S, C, img_size,
                 lambda_coord, lambda_noobj):
    # batch_x: jnp.ndarray (B, 3*(5+C), S, S) float32
    # batch_box: list (len B) of lists of [cls, x, y, w, h] python floats
    B = batch_x.shape[0]
    div = img_size / S

    # ---- pass 1: host-only anchor matching / cell selection -----------------
    # TODO(synk): this .item()-driven per-box control flow (anchor IOU
    # matching, data-dependent cell indices) has no clean Pallas equivalent;
    # it stays host-side exactly as in the reference.
    matched = []
    for b in range(B):
        for abox in batch_box[b]:
            cls, bx, by, bw, bh = [float(v) for v in abox]
            index = _iou_index(bw, bh)
            if s_index <= index <= e_index:
                now_index = index - s_index
                # clamp: the reference would IndexError for boxes on the edge
                ix = min(max(int(bx / div), 0), S - 1)
                iy = min(max(int(by / div), 0), S - 1)
                matched.append(dict(
                    b=b, base=now_index * (5 + C), ix=ix, iy=iy,
                    ax=(bx - ix * div) / div, ay=(by - iy * div) / div,
                    bw=bw, bh=bh, cls=int(cls), anchor=ANCHORS[index]))

    # ---- dispatch the (async) Pallas reduction before any blocking transfer -
    sums_dev = objectness_sumsq(batch_x, C=C)                     # (B,)

    # ---- pass 2: ONE batched gather + ONE device->host copy, NumPy math -----
    loss_boxes = 0.0
    off_vals = [dict() for _ in range(B)]   # (chan, ix, iy) -> objectness val
    if matched:
        bs = np.array([m["b"] for m in matched])
        ixs = np.array([m["ix"] for m in matched])
        iys = np.array([m["iy"] for m in matched])
        cols = np.asarray(batch_x[bs, :, ixs, iys], dtype=np.float32)  # (n, Nc)
        for j, m in enumerate(matched):
            now_x = cols[j]
            base = m["base"]
            res_ax = _sigmoid(float(now_x[base + 1]))
            res_ay = _sigmoid(float(now_x[base + 2]))
            res_w = m["anchor"][0] * float(np.exp(now_x[base + 3]))
            res_h = m["anchor"][1] * float(np.exp(now_x[base + 4]))
            iou = _iou(
                [res_ax * div - res_w / 2, res_ay * div - res_h / 2,
                 res_ax * div + res_w / 2, res_ay * div + res_h / 2],
                [m["ax"] * div - m["bw"] / 2, m["ay"] * div - m["bh"] / 2,
                 m["ax"] * div + m["bw"] / 2, m["ay"] * div + m["bh"] / 2])
            label = _sigmoid(now_x[base + 5: base + 5 + C].astype(np.float64))
            hot = np.zeros((C,), np.float64)
            hot[m["cls"]] = 1.0
            loss_boxes += lambda_coord * (float(now_x[base]) - iou) ** 2
            loss_boxes += float(np.mean((label - hot) ** 2))
            loss_boxes += (res_ax - m["ax"]) ** 2
            loss_boxes += (res_ay - m["ay"]) ** 2
            loss_boxes += (res_w / img_size - m["bw"] / img_size) ** 2
            loss_boxes += (res_h / img_size - m["bh"] / img_size) ** 2
            # cell whose mask bit PyTorch flips to False (dict dedupes repeats)
            off_vals[m["b"]][(base, m["ix"], m["iy"])] = float(now_x[base])

    # ---- no-object MSE term --------------------------------------------------
    # Kernel gives the full sum of squares over the 3 objectness channels;
    # subtract the (few, deduped) matched cells and divide by the analytic
    # element count 3*S*S - #masked_cells (never zero).
    sums = np.asarray(sums_dev)                                   # (B,) f32
    noobj = 0.0
    for b in range(B):
        cnt = 3 * S * S - len(off_vals[b])
        ssq = float(sums[b]) - sum(v * v for v in off_vals[b].values())
        noobj += ssq / cnt

    loss = loss_boxes + lambda_noobj * noobj
    return jnp.asarray([loss], dtype=jnp.float32)


# ----------------------------------------------------------------------------
if __name__ == "__main__":
    key = jax.random.PRNGKey(0)
    B, C, S, img_size = 2, 4, 16, 64
    Nc = 3 * (5 + C)                                  # 27
    batch_x = jax.random.normal(key, (B, Nc, S, S), dtype=jnp.float32)

    # Sanity-check the Pallas reduction against NumPy.
    dev_sums = np.asarray(jax.block_until_ready(objectness_sumsq(batch_x, C=C)))
    x_np = np.asarray(batch_x).astype(np.float64)
    ref_sums = (x_np[:, [0, 5 + C, 2 * (5 + C)], :, :] ** 2).sum(axis=(1, 2, 3))
    assert np.allclose(dev_sums, ref_sums, rtol=1e-4, atol=1e-2), \
        (dev_sums, ref_sums)

    # boxes: [class, x, y, w, h]; three match this scale's anchors, one does not.
    batch_box = [
        [[1.0, 10.0, 22.0, 12.0, 14.0],   # matches anchor 0
         [3.0, 40.0,  8.0, 30.0, 25.0]],  # matches anchor 2
        [[0.0,  5.0, 50.0, 15.0, 28.0],   # matches anchor 1
         [2.0, 33.0, 33.0, 100.0, 80.0]], # matches anchor 6 -> skipped (out of range)
    ]

    loss = yolo_forward(batch_x, batch_box,
                        s_index=0, e_index=2, S=S, C=C, img_size=img_size,
                        lambda_coord=5.0, lambda_noobj=0.5)
    jax.block_until_ready(loss)
    assert loss.shape == (1,) and bool(jnp.isfinite(loss[0]))
    print("KERNEL_OK")
</pallas_src>

<mosaic_0001>
module attributes {stable_mosaic.version = 11 : i64} {
  func.func @_objsq_kernel(%arg0: i32, %arg1: i32, %arg2: memref<1x1x16x16xf32, #tpu.memory_space<vmem>>, %arg3: memref<1x1x8x128xf32, #tpu.memory_space<vmem>>) attributes {dimension_semantics = [#tpu.dimension_semantics<parallel>, #tpu.dimension_semantics<parallel>], iteration_bounds = array<i64: 2, 3>, scalar_prefetch = 0 : i64, scratch_operands = 0 : i64, tpu.core_type = #tpu.core_type<tc>, window_params = [{transform_indices = @transform_0, window_bounds = array<i64: 1, 1, 16, 16>}, {transform_indices = @transform_1, window_bounds = array<i64: 1, 1, 8, 128>}]} {
    %c0 = arith.constant 0 : index
    %c0_0 = arith.constant 0 : index
    %c0_1 = arith.constant 0 : index
    %c0_2 = arith.constant 0 : index
    %0 = vector.load %arg2[%c0, %c0_0, %c0_1, %c0_2] : memref<1x1x16x16xf32, #tpu.memory_space<vmem>>, vector<1x1x16x16xf32>
    %1 = vector.shape_cast %0 : vector<1x1x16x16xf32> to vector<16x16xf32>
    %2 = arith.mulf %1, %1 : vector<16x16xf32>
    %cst = arith.constant dense<0.000000e+00> : vector<16xf32>
    %3 = vector.multi_reduction <add>, %2, %cst [1] : vector<16x16xf32> to vector<16xf32>
    %4 = vector.shape_cast %3 : vector<16xf32> to vector<16x1xf32>
    %cst_3 = arith.constant dense<0.000000e+00> : vector<1xf32>
    %5 = vector.multi_reduction <add>, %4, %cst_3 [0] : vector<16x1xf32> to vector<1xf32>
    %6 = vector.shape_cast %5 : vector<1xf32> to vector<1x1xf32>
    %7 = vector.shape_cast %6 : vector<1x1xf32> to vector<1x1xf32>
    %8 = vector.broadcast %7 : vector<1x1xf32> to vector<8x128xf32>
    %c0_4 = arith.constant 0 : index
    %c0_5 = arith.constant 0 : index
    %c0_6 = arith.constant 0 : index
    %c0_7 = arith.constant 0 : index
    %9 = vector.load %arg3[%c0_4, %c0_5, %c0_6, %c0_7] : memref<1x1x8x128xf32, #tpu.memory_space<vmem>>, vector<1x1x8x128xf32>
    %10 = vector.shape_cast %9 : vector<1x1x8x128xf32> to vector<8x128xf32>
    %11 = vector.shape_cast %8 : vector<8x128xf32> to vector<1x1x8x128xf32>
    tpu.vector_store %arg3[%c0_4, %c0_5, %c0_6, %c0_7], %11 {strides = array<i32>} : memref<1x1x8x128xf32, #tpu.memory_space<vmem>>, vector<1x1x8x128xf32>,
    return
  }
  func.func @transform_0(%arg0: i32, %arg1: i32) -> (i32, i32, i32, i32) {
    %c9_i32 = arith.constant 9 : i32
    %0 = arith.muli %arg1, %c9_i32 : i32
    %c0_i32 = arith.constant 0 : i32
    %c0_i32_0 = arith.constant 0 : i32
    %c0_i32_1 = arith.constant 0 : i32
    return %arg0, %0, %c0_i32, %c0_i32_0 : i32, i32, i32, i32
  }
  func.func @transform_1(%arg0: i32, %arg1: i32) -> (i32, i32, i32, i32) {
    %c0_i32 = arith.constant 0 : i32
    %c0_i32_0 = arith.constant 0 : i32
    %c0_i32_1 = arith.constant 0 : i32
    return %arg0, %arg1, %c0_i32, %c0_i32_0 : i32, i32, i32, i32
  }
}

</mosaic_0001>

<bundles_post_ra>
// kernel: tpu_custom_call.1
= control target key start
LH: loop header
LB: loop body
LE: loop exit
PB: predicated region body
PF: predicated region fallthrough
CT: control target
= control target key end

     0   :  { %6 = vsyncpa [#allocation3], 0  ;;  %s594_s0 = inlined_call_operand.vmem [shape: f32[2,27,16,16], index: 0, kind: input, shape index: {}]   ;;  %s595_s1 = inlined_call_operand.hbm [shape: f32[2,3,8,128], index: 1, kind: output, shape index: {}]  }
   0x1   :  { %8 = vsyncpa [#allocation3 + $0x1], 0  ;;  %s458_s6 = smov 0   ;;  %s460_s7 = smov 0  }
   0x2   :  { %s462_s8 = smov 0   ;;  %s464_s9 = smov 0  }
   0x3   :  { %s466_s10 = smov 0   ;;  %s468_s11 = smov 0  }
   0x4   :  { %s470_s12 = smov 0   ;;  %s472_s13 = smov 0  }
   0x5 LB: > { %s266_s14 = sadd.s32 4294967295, %s445_s13   ;;  %s267_s15 = sadd.s32 4294967294, %s445_s13   ;;  %s445_s13 = sphi %s472_s13, %s14_s13   ;;  %s441_s12 = sphi %s470_s12, %s604_s12   ;;  %s437_s11 = sphi %s468_s11, %s603_s11   ;;  %s433_s10 = sphi %s466_s10, %s602_s10   ;;  %s429_s9 = sphi %s464_s9, %s601_s9   ;;  %s425_s8 = sphi %s462_s8, %s600_s8   ;;  %s421_s7 = sphi %s460_s7, %s599_s7   ;;  %s417_s6 = sphi %s458_s6, %s598_s6  }
   0x6   : > { %s23_s16 = sadd.s32 1, %s437_s11  ;;  %s26_s17 = sadd.s32 1, %s441_s12 }
   0x7   : > { %p24_p0 = scmp.ge.s32.totalorder %s23_s16, 3  ;;  %p75_p1 = scmp.ne.s32.totalorder %s425_s8, %s421_s7 }
   0x8   : > { %p76_p2 = scmp.eq.s32.totalorder %s266_s14, 5  ;;  %p81_p5 = scmp.ne.s32.totalorder %s421_s7, %s417_s6 }
   0x9   : > { %s606_s16 = smov (%p24_p0, %s23_s16), 0  ;;  %s608_s17 = smov (!%p24_p0, %s26_s17), %s441_s12 }
   0xa   : > { %s61_s18 = ssub.s32 %s437_s11, %s606_s16  ;;  %p509_p3 = por %p76_p2, %p75_p1 }
   0xb   : > { %p28_p4 = scmp.ge.s32.totalorder %s608_s17, 2  ;;  %p82_p6 = scmp.eq.s32.totalorder %s267_s15, 5 }
   0xc   : > { %p270_p7 = scmp.ge.s32.totalorder %s445_s13, 1  ;;  %p114_p9 = scmp.lt.s32.totalorder %s445_s13, 7 }
   0xd   : > { %s610_s17 = smov (%p28_p4, %s608_s17), 0  ;;  %p518_p8 = por %p82_p6, %p81_p5 }
   0xe   : > { %s60_s21 = ssub.s32 %s441_s12, %s610_s17  ;;  %s65_s22 = sadd.s32 1, %s425_s8 }
   0xf   : > { %s62_s23 = sor.u32 %s61_s18, %s60_s21  ;;  %p115_p10 = pnand %p270_p7, %p114_p9 }
  0x10   : > { %p63_p11 = scmp.eq.s32.totalorder %s62_s23, 0  ;;  %s139_s25 = smul.u32 (!%p115_p10), 9, %s429_s9  ;;  %vm154_vm0 = vcmask (!%p115_p10), 130048  }
  0x11   : > { %118 = sbr.rel (%p115_p10) target bundleno = 209 (0xd1), region = 24  ;;  %p140_p12 = scmp.lt.s32.totalorder (!%p115_p10), %s433_s10, 1 }
  0x12   : > { %s527_s24 = scalar_select %p63_p11, %s425_s8, %s65_s22  }
  0x13   : > { %p142_p13 = scmp.lt.s32.totalorder (!%p115_p10), %s139_s25, 26  ;;  %s136_s5 = sand.u32 (!%p115_p10), 1, %s421_s7  }
  0x14   : > { %s279_s14 = smul.u32 (!%p115_p10), 3, %s433_s10  ;;  %s271_s15 = sshll.u32 (!%p115_p10), %s136_s5, 3 }
  0x15   : > { %s138_s22 = scalar_lea.vmem (!%p115_p10), [#allocation2], %s271_s15 }
  0x16   : > { %s181_s18 = sadd.s32 (!%p115_p10), %s429_s9, %s279_s14  ;;  %s185_s23 = sshll.u32 (!%p115_p10), %s138_s22, 4  ;;  %s543_s23 = int_to_ptr.vmem [resolvable:$true] %s185_s23 }
  0x17   : > { %s275_s21 = sshll.u32 (!%p115_p10), %s181_s18, 7  ;;  %s447_s9 = smov (!%p115_p10), [#allocation2]  }
  0x18   : > { %s141_s26 = scalar_select %p140_p12, %s433_s10, 1 }
  0x19   : > { %s612_s25 = smov (!%p142_p13, %s139_s25), 26  ;;  %s170_s10 = scalar_lea.sflag [#allocation3], %s136_s5 }
  0x1a   : > { %s278_s27 = smul.u32 54, %s141_s26  ;;  %s272_s28 = sshll.u32 %s612_s25, 1 }
  0x1c   : > { %s146_s29 = sadd.s32 %s278_s27, %s272_s28  ;;  %s541_s27 = scalar_lea.hbm %s595_s1, %s275_s21 }
  0x1d   : > { %s273_s30 = sshll.u32 %s146_s29, 3  ;;  %s351_s28 = scalar_lea.vmem %s543_s23, 128 }
  0x1e   : > { %s148_s4 = scalar_lea.vmem %s594_s0, %s273_s30  ;;  %p352_p0 = scmp.ne.s32.totalorder %s543_s23, %s351_s28 }
  0x1f   : > { %v150_v0 = vld [vmem:[%s148_s4] sm:$0xff]  ;;  %v151_v1 = vld [vmem:[%s148_s4 + $0x8] sm:$0xff]  ;;  %s355_s29 = sshll.u32 %s447_s9, 4  ;;  %s356_s29 = int_to_ptr.vmem [resolvable:$false] %s355_s29 }
  0x20   : > { %v152_v2 = vmul.f32 %v150_v0, %v150_v0  ;;  %v153_v3 = vmul.f32 %v151_v1, %v151_v1  ;;  %p353_p1 = pnand %p352_p0, %p509_p3  ;;  %s357_s30 = scalar_lea.vmem %s356_s29, 256 }
  0x21   : > { %p358_p4 = scmp.lt.s32.totalorder %s543_s23, %s356_s29  ;;  %p359_p5 = scmp.lt.s32.totalorder %s357_s30, %s351_s28 }
  0x22   : > { %v155_v4 = vsel %vm154_vm0, %v152_v2, 0.0  ;;  %v158_v5 = vsel %vm154_vm0, %v153_v3, 0.0  ;;  %p354_p2 = pneg %p353_p1 }
  0x23   : > { %156 = vadd.xlane.f32.xlu0 %v155_v4  ;;  %p360_p6 = por %p359_p5, %p358_p4 }
  0x25   : > { %p361_p7 = pnand %p360_p6, %p354_p2 }
  0x27   : > { %159 = vadd.xlane.f32.xlu0 %v158_v5 }
  0xb0   : > { %v157_v6 = vpop.xlane.xlu0 %156 }
  0xb4   : > { %v160_v7 = vpop.xlane.xlu0 %159 }
  0xb5   : > { %v161_v8 = vadd.f32 %v160_v7, %v157_v6 }
  0xb7   : > { %v162_v9 = vrot.slane %v161_v8, 4 }
  0xb9   : > { %v163_v10 = vadd.f32 %v162_v9, %v161_v8 }
  0xbb   : > { %v164_v11 = vrot.slane %v163_v10, 2 }
  0xbd   : > { %v165_v12 = vadd.f32 %v164_v11, %v163_v10 }
  0xbf   : > { %v166_v13 = vrot.slane %v165_v12, 1 }
  0xc1   : > { %v167_v14 = vadd.f32 %v166_v13, %v165_v12 }
  0xc3   : > { %168 = vst [vmem:[%s138_s22] sm:$0xff] %v167_v14 }
  0xc4   : > { %364 = shalt.err (!%p361_p7)
}
  0xc5   : > { %s365_s2 = scalar_lea.hbm %s541_s27, 128  ;;  %s369_s5 = scalar_lea.hbm %s595_s1, 768 }
  0xc6   : > { %p366_p9 = scmp.ne.s32.totalorder %s541_s27, %s365_s2  ;;  %p370_p12 = scmp.lt.u32.totalorder %s541_s27, %s595_s1 }
  0xc7   : > { %p371_p13 = scmp.lt.u32.totalorder %s369_s5, %s365_s2  ;;  %p373_p1 = scmp.lt.u32.totalorder %s365_s2, %s541_s27 }
  0xc8   : > { %p367_p10 = pnand %p366_p9, %p509_p3 }
  0xc9   : > { %p372_p0 = por %p371_p13, %p370_p12 }
  0xca   : > { %p368_p11 = pneg %p367_p10 }
  0xcb   : > { %p374_p2 = por %p373_p1, %p372_p0 }
  0xcd   : > { %p375_p4 = pnand %p374_p2, %p368_p11 }
  0xcf   : > { %378 = shalt.err (!%p375_p4)
}
  0xd0   : > { %280 = dma.vmem_to_hbm [thread:$0]  (%p509_p3), %s543_s23, 128, %s541_s27, %s170_s10  }
  0xd1 PF: > { %p286_p5 = scmp.ge.s32.totalorder %s445_s13, 2  ;;  %s197_s18 = sand.u32 1, %s417_s6  }
  0xd2   : > { %s198_s21 = scalar_lea.sflag [#allocation3], %s197_s18 }
  0xd3   : > { %p283_p6 = pnand %p286_p5, %p518_p8 }
  0xd5   : > { %412 = dma.done.wait (!%p283_p6), %s198_s21, 128  }
  0xd6   : > { %414 = vsyncadd (!%p283_p6), %s198_s21, 4294967168  ;;  %s14_s13 = sadd.s32 1, %s445_s13   ;;  %s598_s6 = smov %s421_s7 }
  0xd7   : > { %p11_p7 = scmp.ge.s32.totalorder %s14_s13, 8   ;;  %s599_s7 = smov %s425_s8 }
  0xd8   : > { %s600_s8 = smov %s527_s24  ;;  %s601_s9 = smov %s437_s11 }
  0xd9   : > { %s602_s10 = smov %s441_s12  ;;  %s603_s11 = smov %s606_s16 }
  0xda   : > { %s604_s12 = smov %s610_s17  ;;  %13 = sbr.rel (!%p11_p7) target bundleno = 5 (0x5), region = 59 }
  0xe1   :  { %203 = vsyncpa [#allocation3], 1 }
  0xe2   :  { %205 = vsyncpa [#allocation3 + $0x1], 1 }

</bundles_post_ra>
